<compile_context>
chip_gen: v7x
topology: tpu7x:2x2x1
jax: 0.10.0
libtpu: 0.0.40
codegen_flags: <defaults>
</compile_context>

<pallas_src>
import functools

import jax
import jax.numpy as jnp
from jax.experimental import pallas as pl
from jax.experimental.pallas import tpu as pltpu


def _round_up(x: int, m: int) -> int:
    return ((x + m - 1) // m) * m


def mlp_kernel(x_ref, w1_ref, b1_ref, w2_ref, b2_ref, o_ref):
    # Two MXU matmuls with f32 accumulation; bias add + ReLU on the VPU in f32.
    x = x_ref[...]
    h = jnp.dot(x, w1_ref[...], preferred_element_type=jnp.float32)
    h = h + b1_ref[...].astype(jnp.float32)      # (1, H_pad) broadcast over rows
    h = jnp.maximum(h, 0.0)                      # ReLU in f32
    y = jnp.dot(h.astype(w2_ref.dtype), w2_ref[...],
                preferred_element_type=jnp.float32)
    y = y + b2_ref[...].astype(jnp.float32)      # (1, N_pad)
    o_ref[...] = y.astype(o_ref.dtype)


@functools.partial(jax.jit, static_argnames=("tile_b",))
def mlp_forward(x, w1, b1, w2, b2, *, tile_b: int = 512):
    """x: (B, input_size); w1: (input_size, hidden); w2: (hidden, classes).

    Weights are stored transposed vs PyTorch nn.Linear (.weight is (out, in));
    math is y = relu(x @ W1 + b1) @ W2 + b2, identical to the reference module.
    Returns (B, num_classes).
    """
    B, K = x.shape
    H = w1.shape[1]
    N = w2.shape[1]
    dtype = x.dtype
    itemsize = jnp.dtype(dtype).itemsize

    # --- lane-dense padding of the N dims (zeros -> no effect on the result) ---
    H_pad = _round_up(max(H, 128), 128)
    N_pad = _round_up(max(N, 128), 128)
    w1p = jnp.zeros((K, H_pad), w1.dtype).at[:, :H].set(w1)
    b1p = jnp.zeros((1, H_pad), b1.dtype).at[0, :H].set(b1)
    w2p = jnp.zeros((H_pad, N_pad), w2.dtype).at[:H, :N].set(w2)
    b2p = jnp.zeros((1, N_pad), b2.dtype).at[0, :N].set(b2)

    # --- batch tiling (sublane-aligned: 8 rows for f32, 16 for bf16) ---
    sub = 16 if dtype == jnp.bfloat16 else 8
    tb = min(_round_up(tile_b, sub), _round_up(B, sub))
    B_pad = _round_up(B, tb)
    if B_pad != B:
        x = jnp.pad(x, ((0, B_pad - B), (0, 0)))
    grid = (B_pad // tb,)

    # --- VMEM budget: double-buffered x/out tiles + resident weights/biases ---
    vmem_need = (2 * tb * K + 2 * tb * N_pad) * itemsize \
        + (K * H_pad + H_pad * N_pad + 2 * (H_pad + N_pad)) * itemsize
    vmem_limit = int(min(max(2 * vmem_need + (1 << 20), 16 << 20), 64 << 20))

    flops = 2 * B_pad * (K * H_pad + H_pad * N_pad)
    bytes_accessed = (B_pad * K + B_pad * N_pad) * itemsize \
        + (K * H_pad + H_pad * N_pad + H_pad + N_pad) * itemsize

    out = pl.pallas_call(
        mlp_kernel,
        out_shape=jax.ShapeDtypeStruct((B_pad, N_pad), dtype),
        grid=grid,
        in_specs=[
            pl.BlockSpec((tb, K), lambda i: (i, 0)),         # x: tiled over batch
            pl.BlockSpec((K, H_pad), lambda i: (0, 0)),      # W1: resident
            pl.BlockSpec((1, H_pad), lambda i: (0, 0)),      # b1: resident
            pl.BlockSpec((H_pad, N_pad), lambda i: (0, 0)),  # W2: resident
            pl.BlockSpec((1, N_pad), lambda i: (0, 0)),      # b2: resident
        ],
        out_specs=pl.BlockSpec((tb, N_pad), lambda i: (i, 0)),
        compiler_params=pltpu.CompilerParams(
            dimension_semantics=("parallel",),
            vmem_limit_bytes=vmem_limit,
        ),
        cost_estimate=pl.CostEstimate(
            flops=flops, transcendentals=0, bytes_accessed=bytes_accessed),
    )(x, w1p, b1p, w2p, b2p)

    # Strip the batch padding and the zero lane-padding.
    return out[:B, :N]


def init_params(key, input_size, hidden, num_classes, dtype=jnp.float32):
    """Deterministic, PyTorch-Linear-like init (uniform +- 1/sqrt(fan_in))."""
    k1, k2, k3, k4 = jax.random.split(key, 4)
    bound1 = 1.0 / (input_size ** 0.5)
    bound2 = 1.0 / (hidden ** 0.5)
    w1 = jax.random.uniform(k1, (input_size, hidden), dtype, -bound1, bound1)
    b1 = jax.random.uniform(k2, (hidden,), dtype, -bound1, bound1)
    w2 = jax.random.uniform(k3, (hidden, num_classes), dtype, -bound2, bound2)
    b2 = jax.random.uniform(k4, (num_classes,), dtype, -bound2, bound2)
    return w1, b1, w2, b2


if __name__ == "__main__":
    batch = 2
    input_size = 64
    hidden = 50          # fixed by the module: nn.Linear(input_size, 50)
    num_classes = 10

    key = jax.random.PRNGKey(0)
    kx, kp = jax.random.split(key)
    x = jax.random.normal(kx, (batch, input_size), jnp.float32)
    w1, b1, w2, b2 = init_params(kp, input_size, hidden, num_classes)

    # --- f32 path (tight tolerance) ---
    out = mlp_forward(x, w1, b1, w2, b2)
    jax.block_until_ready(out)
    ref = jnp.maximum(x @ w1 + b1, 0.0) @ w2 + b2
    assert out.shape == (batch, num_classes)
    assert jnp.allclose(out, ref, atol=1e-5, rtol=1e-5)

    # --- bf16 path (bandwidth-optimized; f32 accumulation inside the kernel) ---
    xb = x.astype(jnp.bfloat16)
    w1b, b1b = w1.astype(jnp.bfloat16), b1.astype(jnp.bfloat16)
    w2b, b2b = w2.astype(jnp.bfloat16), b2.astype(jnp.bfloat16)
    out_bf16 = mlp_forward(xb, w1b, b1b, w2b, b2b)
    jax.block_until_ready(out_bf16)
    assert out_bf16.shape == (batch, num_classes)
    assert jnp.allclose(out_bf16.astype(jnp.float32), ref, atol=5e-2, rtol=5e-2)

    print("KERNEL_OK")
</pallas_src>

<mosaic_0001>
module attributes {stable_mosaic.version = 11 : i64} {
  func.func @mlp_kernel(%arg0: i32, %arg1: memref<8x64xf32, #tpu.memory_space<vmem>>, %arg2: memref<64x128xf32, #tpu.memory_space<vmem>>, %arg3: memref<1x128xf32, #tpu.memory_space<vmem>>, %arg4: memref<128x128xf32, #tpu.memory_space<vmem>>, %arg5: memref<1x128xf32, #tpu.memory_space<vmem>>, %arg6: memref<8x128xf32, #tpu.memory_space<vmem>>) attributes {dimension_semantics = [#tpu.dimension_semantics<parallel>], iteration_bounds = array<i64: 1>, scalar_prefetch = 0 : i64, scratch_operands = 0 : i64, tpu.core_type = #tpu.core_type<tc>, window_params = [{transform_indices = @transform_0, window_bounds = array<i64: 8, 64>}, {pipeline_mode = #tpu.pipeline_mode<synchronous>, transform_indices = @transform_1, window_bounds = array<i64: 64, 128>}, {pipeline_mode = #tpu.pipeline_mode<synchronous>, transform_indices = @transform_2, window_bounds = array<i64: 1, 128>}, {pipeline_mode = #tpu.pipeline_mode<synchronous>, transform_indices = @transform_3, window_bounds = array<i64: 128, 128>}, {pipeline_mode = #tpu.pipeline_mode<synchronous>, transform_indices = @transform_4, window_bounds = array<i64: 1, 128>}, {transform_indices = @transform_5, window_bounds = array<i64: 8, 128>}]} {
    %c0 = arith.constant 0 : index
    %c0_0 = arith.constant 0 : index
    %0 = vector.load %arg1[%c0, %c0_0] : memref<8x64xf32, #tpu.memory_space<vmem>>, vector<8x64xf32>
    %c0_1 = arith.constant 0 : index
    %c0_2 = arith.constant 0 : index
    %1 = vector.load %arg2[%c0_1, %c0_2] : memref<64x128xf32, #tpu.memory_space<vmem>>, vector<64x128xf32>
    %cst = arith.constant dense<0.000000e+00> : vector<8x128xf32>
    %2 = tpu.matmul %0, %1, %cst {dimension_numbers = #tpu.dot_dimension_numbers<[1], [0], [0], [1], [0, 0, 1, 1], [], []>} : vector<8x64xf32>, vector<64x128xf32>, vector<8x128xf32> -> vector<8x128xf32>
    %c0_3 = arith.constant 0 : index
    %c0_4 = arith.constant 0 : index
    %3 = vector.load %arg3[%c0_3, %c0_4] : memref<1x128xf32, #tpu.memory_space<vmem>>, vector<1x128xf32>
    %4 = vector.broadcast %3 : vector<1x128xf32> to vector<8x128xf32>
    %5 = arith.addf %2, %4 : vector<8x128xf32>
    %cst_5 = arith.constant 0.000000e+00 : f32
    %6 = vector.broadcast %cst_5 : f32 to vector<8x128xf32>
    %7 = arith.maximumf %5, %6 : vector<8x128xf32>
    %c0_6 = arith.constant 0 : index
    %c0_7 = arith.constant 0 : index
    %8 = vector.load %arg4[%c0_6, %c0_7] : memref<128x128xf32, #tpu.memory_space<vmem>>, vector<128x128xf32>
    %cst_8 = arith.constant dense<0.000000e+00> : vector<8x128xf32>
    %9 = tpu.matmul %7, %8, %cst_8 {dimension_numbers = #tpu.dot_dimension_numbers<[1], [0], [0], [1], [0, 0, 1, 1], [], []>} : vector<8x128xf32>, vector<128x128xf32>, vector<8x128xf32> -> vector<8x128xf32>
    %c0_9 = arith.constant 0 : index
    %c0_10 = arith.constant 0 : index
    %10 = vector.load %arg5[%c0_9, %c0_10] : memref<1x128xf32, #tpu.memory_space<vmem>>, vector<1x128xf32>
    %11 = vector.broadcast %10 : vector<1x128xf32> to vector<8x128xf32>
    %12 = arith.addf %9, %11 : vector<8x128xf32>
    %c0_11 = arith.constant 0 : index
    %c0_12 = arith.constant 0 : index
    %13 = vector.load %arg6[%c0_11, %c0_12] : memref<8x128xf32, #tpu.memory_space<vmem>>, vector<8x128xf32>
    tpu.vector_store %arg6[%c0_11, %c0_12], %12 {strides = array<i32>} : memref<8x128xf32, #tpu.memory_space<vmem>>, vector<8x128xf32>,
    return
  }
  func.func @transform_0(%arg0: i32) -> (i32, i32) {
    %c0_i32 = arith.constant 0 : i32
    %c0_i32_0 = arith.constant 0 : i32
    return %arg0, %c0_i32 : i32, i32
  }
  func.func @transform_1(%arg0: i32) -> (i32, i32) {
    %c0_i32 = arith.constant 0 : i32
    %c0_i32_0 = arith.constant 0 : i32
    %c0_i32_1 = arith.constant 0 : i32
    return %c0_i32, %c0_i32_0 : i32, i32
  }
  func.func @transform_2(%arg0: i32) -> (i32, i32) {
    %c0_i32 = arith.constant 0 : i32
    %c0_i32_0 = arith.constant 0 : i32
    %c0_i32_1 = arith.constant 0 : i32
    return %c0_i32, %c0_i32_0 : i32, i32
  }
  func.func @transform_3(%arg0: i32) -> (i32, i32) {
    %c0_i32 = arith.constant 0 : i32
    %c0_i32_0 = arith.constant 0 : i32
    %c0_i32_1 = arith.constant 0 : i32
    return %c0_i32, %c0_i32_0 : i32, i32
  }
  func.func @transform_4(%arg0: i32) -> (i32, i32) {
    %c0_i32 = arith.constant 0 : i32
    %c0_i32_0 = arith.constant 0 : i32
    %c0_i32_1 = arith.constant 0 : i32
    return %c0_i32, %c0_i32_0 : i32, i32
  }
  func.func @transform_5(%arg0: i32) -> (i32, i32) {
    %c0_i32 = arith.constant 0 : i32
    %c0_i32_0 = arith.constant 0 : i32
    return %arg0, %c0_i32 : i32, i32
  }
}

</mosaic_0001>

<bundles_post_ra>
// kernel: mlp_forward.1
= control target key start
LH: loop header
LB: loop body
LE: loop exit
PB: predicated region body
PF: predicated region fallthrough
CT: control target
= control target key end

     0   :  { %v331_v0 = vmov 0.0|0.0   ;;  %vm332_vm0 = vmmov 0   ;;  %v333_v4 = vmov 0.0   ;;  %vm36_vm1 = vcmask 523264   ;;  %s460_s1 = inlined_call_operand.vmem [shape: f32[64,128], index: 1, kind: input, shape index: {}]   ;;  %s461_s3 = inlined_call_operand.vmem [shape: f32[128,128], index: 3, kind: input, shape index: {}]   ;;  %s462_s0 = inlined_call_operand.vmem [shape: f32[8,64], index: 0, kind: input, shape index: {}]   ;;  %s463_s2 = inlined_call_operand.vmem [shape: f32[1,128], index: 2, kind: input, shape index: {}]   ;;  %s464_s4 = inlined_call_operand.vmem [shape: f32[1,128], index: 4, kind: input, shape index: {}]   ;;  %s465_s5 = inlined_call_operand.vmem [shape: f32[8,128], index: 5, kind: output, shape index: {}]  }
   0x1   :  { %292 = vmatprep.subr.bf16.mxu0 %v331_v0  ;;  %v21_v1 = vld [vmem:[%s460_s1] sm:$0xff]  ;;  %v22_v2 = vld [vmem:[%s460_s1 + $0x8] sm:$0xff]  ;;  %v23_v3 = vld [vmem:[%s460_s1 + $0x10] sm:$0xff]  ;;  %254 = vmatprep.mubr.msk.f32.mxu0 %vm332_vm0, %v333_v4 }
   0x2   :  { %v293_v5 = vpack.c.bf16 %v22_v2, %v21_v1  ;;  %v24_v6 = vld [vmem:[%s460_s1 + $0x18] sm:$0xff]  ;;  %304 = vmatprep.subr.bf16.mxu1 %v331_v0  ;;  %289 = vmatprep.mubr.msk.f32.mxu1 %vm332_vm0, %v333_v4  ;;  %v111_v8 = vld [vmem:[%s461_s3] sm:$0xff]  ;;  %v112_v9 = vld [vmem:[%s461_s3 + $0x8] sm:$0xff] }
   0x3   :  { %v296_v7 = vpack.c.bf16 %v24_v6, %v23_v3  ;;  %v113_v10 = vld [vmem:[%s461_s3 + $0x10] sm:$0xff]  ;;  %v25_v11 = vld [vmem:[%s460_s1 + $0x20] sm:$0xff]  ;;  %v26_v12 = vld [vmem:[%s460_s1 + $0x28] sm:$0xff]  ;;  %v305_v13 = vpack.c.bf16 %v112_v9, %v111_v8 }
   0x4   :  { %294 = vmatpush3.bf16.msra.mxu0 %v293_v5  ;;  %v114_v14 = vld [vmem:[%s461_s3 + $0x18] sm:$0xff]  ;;  %v299_v16 = vpack.c.bf16 %v26_v12, %v25_v11  ;;  %v115_v17 = vld [vmem:[%s461_s3 + $0x20] sm:$0xff]  ;;  %v116_v18 = vld [vmem:[%s461_s3 + $0x28] sm:$0xff] }
   0x5   :  { %295 = vmatprep.subr.bf16.mxu0 %v331_v0  ;;  %306 = vmatpush3.bf16.msra.mxu1 %v305_v13  ;;  %v308_v15 = vpack.c.bf16 %v114_v14, %v113_v10  ;;  %v27_v19 = vld [vmem:[%s460_s1 + $0x30] sm:$0xff]  ;;  %v28_v20 = vld [vmem:[%s460_s1 + $0x38] sm:$0xff]  ;;  %v311_v21 = vpack.c.bf16 %v116_v18, %v115_v17  ;;  %v20_v26 = vld [vmem:[%s462_s0] sm:$0xff] }
   0x6   :  { %307 = vmatprep.subr.bf16.mxu1 %v331_v0  ;;  %v302_v22 = vpack.c.bf16 %v28_v20, %v27_v19  ;;  %v117_v23 = vld [vmem:[%s461_s3 + $0x30] sm:$0xff]  ;;  %v118_v24 = vld [vmem:[%s461_s3 + $0x38] sm:$0xff]  ;;  %v119_v27 = vld [vmem:[%s461_s3 + $0x40] sm:$0xff] }
   0x7   :  { %v314_v25 = vpack.c.bf16 %v118_v24, %v117_v23  ;;  %v120_v28 = vld [vmem:[%s461_s3 + $0x48] sm:$0xff]  ;;  %v121_v30 = vld [vmem:[%s461_s3 + $0x50] sm:$0xff]  ;;  %v122_v31 = vld [vmem:[%s461_s3 + $0x58] sm:$0xff] }
   0x8   :  { %297 = vmatpush3.bf16.msra.mxu0 %v296_v7  ;;  %v317_v29 = vpack.c.bf16 %v120_v28, %v119_v27  ;;  %v320_v32 = vpack.c.bf16 %v122_v31, %v121_v30  ;;  %v123_v33 = vld [vmem:[%s461_s3 + $0x60] sm:$0xff]  ;;  %v124_v34 = vld [vmem:[%s461_s3 + $0x68] sm:$0xff]  ;;  %v125_v36 = vld [vmem:[%s461_s3 + $0x70] sm:$0xff] }
   0x9   :  { %298 = vmatprep.subr.bf16.mxu0 %v331_v0  ;;  %309 = vmatpush3.bf16.msra.mxu1 %v308_v15  ;;  %v323_v35 = vpack.c.bf16 %v124_v34, %v123_v33  ;;  %v126_v37 = vld [vmem:[%s461_s3 + $0x78] sm:$0xff]  ;;  %v209_v39 = vld [vmem:[%s463_s2] ss:$0 sm:$0xff] }
   0xa   :  { %310 = vmatprep.subr.bf16.mxu1 %v331_v0  ;;  %v326_v38 = vpack.c.bf16 %v126_v37, %v125_v36  ;;  %v211_v44 = vld [vmem:[%s464_s4] ss:$0 sm:$0xff] }
   0xc   :  { %300 = vmatpush3.bf16.msra.mxu0 %v299_v16 }
   0xd   :  { %301 = vmatprep.subr.bf16.mxu0 %v331_v0  ;;  %312 = vmatpush3.bf16.msra.mxu1 %v311_v21 }
   0xe   :  { %313 = vmatprep.subr.bf16.mxu1 %v331_v0 }
  0x10   :  { %303 = vmatpush3.bf16.msra.mxu0 %v302_v22 }
  0x11   :  { %315 = vmatpush3.bf16.msra.mxu1 %v314_v25 }
  0x12   :  { %316 = vmatprep.subr.bf16.mxu1 %v331_v0 }
  0x13   :  { %255 = vmatmul.mubr.msk.f32.vlgmr.msra.gmra.mrb[0].mxu0 %vm36_vm1, %v20_v26 }
  0x15   :  { %318 = vmatpush3.bf16.msra.mxu1 %v317_v29 }
  0x16   :  { %319 = vmatprep.subr.bf16.mxu1 %v331_v0 }
  0x19   :  { %321 = vmatpush3.bf16.msra.mxu1 %v320_v32 }
  0x1a   :  { %322 = vmatprep.subr.bf16.mxu1 %v331_v0 }
  0x1d   :  { %324 = vmatpush3.bf16.msra.mxu1 %v323_v35 }
  0x1e   :  { %325 = vmatprep.subr.bf16.mxu1 %v331_v0 }
  0x21   :  { %327 = vmatpush3.bf16.msra.mxu1 %v326_v38 }
  0xe6   :  { %v106_v40 = vpop.f32.mrb[0].mxu0 }
  0xe7   :  { %v107_v41 = vadd.f32 %v209_v39, %v106_v40  ;;  %v256_v42 = vpop.f32.mrb[1].mxu0 }
  0xe9   :  { %v110_v43 = vmax.f32 %v107_v41, 0.0 }
  0xeb   :  { %290 = vmatmul.mubr.f32.vlgmr.msra.gmra.mrb[0].mxu1 %v110_v43 }
 0x1be   :  { %v200_v45 = vpop.f32.mrb[0].mxu1 }
 0x1bf   :  { %v201_v46 = vadd.f32 %v211_v44, %v200_v45  ;;  %v291_v47 = vpop.f32.mrb[1].mxu1 }
 0x1c1   :  { %204 = vst [vmem:[%s465_s5] sm:$0xff] %v201_v46 }

</bundles_post_ra>
